<compile_context>
chip_gen: v6e
topology: v6e:2x2x1
jax: 0.10.0
libtpu: 0.0.40
codegen_flags: <defaults>
</compile_context>

<pallas_src>
import jax
import jax.numpy as jnp
from jax.experimental import pallas as pl
from jax.experimental.pallas import tpu as pltpu


def _round_up(x, m):
    return ((x + m - 1) // m) * m


def _cdiv(a, b):
    return (a + b - 1) // b


def _choose_tk(B, N, hop, K, tk_max=4096, block_budget_bytes=20 << 20, min_blocks=8):
    """Lane-dense K tile: multiple of 128, VMEM-safe on every generation (v7x included),
    with enough parallel grid blocks for v7x's two TensorCores."""
    # f32 bytes per K column held in double-buffered blocks: output (N) x2, lo & hi (hop) x2.
    per_col = 4 * (2 * N + 2 * 2 * hop)
    tk_vmem = max(128, (block_budget_bytes // per_col) // 128 * 128)
    tk = max(128, min(tk_max, tk_vmem, _round_up(K, 128)))
    # Megacore occupancy: shrink the tile while it buys more parallel blocks.
    while tk > 128 and B * _cdiv(K, tk) < min_blocks:
        tk = max(128, ((tk // 2) // 128) * 128)
    return tk


def _encoder_kernel(xlo_ref, xhi_ref, w_ref, out_ref):
    # xlo_ref, xhi_ref: (1, hop, tk) -- chunk k / chunk k+1 of each frame, K lane-dense
    # w_ref:            (N, L)       -- full filter bank, VMEM-resident across the whole grid
    # out_ref:          (1, N, tk)   -- output tile, already N-major / K lane-dense
    x = jnp.concatenate([xlo_ref[0], xhi_ref[0]], axis=0)          # (L, tk) frame matrix
    acc = jnp.dot(w_ref[...], x, preferred_element_type=jnp.float32)
    out_ref[0] = jnp.maximum(acc, 0.0).astype(out_ref.dtype)       # ReLU


def encoder_forward(mixture, weight, L, tk_max=4096):
    """mixture: [B, T] float32, weight: [N, L] float32 (== conv1d_U.weight[:, 0, :]).

    Returns mixture_w: [B, N, K] with K = (T - L) // (L//2) + 1, matching PyTorch Conv1d + ReLU.
    """
    B, T = mixture.shape
    N, Lw = weight.shape
    assert Lw == L and L % 2 == 0
    hop = L // 2
    K = (T - L) // hop + 1
    assert K >= 1

    # Single strided transpose: non-overlapping hop chunks, hop-major, K lane-dense.
    # (K+1)*hop <= T always holds given K's definition, so chunk K (frame K-1's 2nd half) exists.
    ch = jnp.transpose(mixture[:, : (K + 1) * hop].reshape(B, K + 1, hop), (0, 2, 1))  # (B,hop,K+1)
    lo = ch[:, :, :K]        # lo[b, :, k] = mixture[b,  k   *hop :  k   *hop + hop]
    hi = ch[:, :, 1:K + 1]   # hi[b, :, k] = mixture[b, (k+1)*hop : (k+1)*hop + hop]

    tk = _choose_tk(B, N, hop, K, tk_max=tk_max)
    grid = (B, _cdiv(K, tk))   # ragged last K tile handled by Pallas (masked stores)

    cost = pl.CostEstimate(
        flops=2 * B * N * L * K,
        transcendentals=0,
        bytes_accessed=4 * (B * N * K + 2 * B * hop * K + N * L),
    )

    out = pl.pallas_call(
        _encoder_kernel,
        out_shape=jax.ShapeDtypeStruct((B, N, K), jnp.float32),
        grid_spec=pltpu.PrefetchScalarGridSpec(
            num_scalar_prefetch=0,
            grid=grid,
            in_specs=[
                pl.BlockSpec((1, hop, tk), lambda b, j: (b, 0, j)),  # lo chunks
                pl.BlockSpec((1, hop, tk), lambda b, j: (b, 0, j)),  # hi chunks
                pl.BlockSpec((N, L), lambda b, j: (0, 0)),           # filter bank (resident)
            ],
            out_specs=pl.BlockSpec((1, N, tk), lambda b, j: (b, 0, j)),
        ),
        compiler_params=pltpu.CompilerParams(
            dimension_semantics=("parallel", "parallel"),
            vmem_limit_bytes=32 * 1024 * 1024,   # above v5e's 16 MiB default, within v7x physical
        ),
        cost_estimate=cost,
    )(lo, hi, weight)

    return out


def reference_forward(mixture, weight, L):
    """Pure-JAX reference of the PyTorch forward (for sanity check)."""
    stride = L // 2
    B, T = mixture.shape
    K = (T - L) // stride + 1
    start_idx = jnp.arange(K) * stride
    gather_idx = start_idx[:, None] + jnp.arange(L)[None, :]
    frames = mixture[:, gather_idx]                          # (B, K, L)
    out = jnp.einsum("bkl,nl->bnk", frames, weight)
    return jnp.maximum(out, 0.0)


if __name__ == "__main__":
    # Small shapes consistent with the module: L=16, N=32, batch=2, T=64 samples.
    L, N = 16, 32
    B, T = 2, 64

    key = jax.random.PRNGKey(0)
    k_x, k_w = jax.random.split(key)
    mixture = jax.random.normal(k_x, (B, T), dtype=jnp.float32)
    # conv1d_U.weight has shape [N, 1, L] in torch -> [N, L] here.
    weight = jax.random.normal(k_w, (N, L), dtype=jnp.float32) * 0.1

    out = encoder_forward(mixture, weight, L)
    out = jax.block_until_ready(out)

    ref = reference_forward(mixture, weight, L)
    K = (T - L) // (L // 2) + 1
    assert out.shape == ref.shape == (B, N, K)
    assert jnp.allclose(out, ref, atol=1e-5, rtol=1e-5)

    print("KERNEL_OK")
</pallas_src>

<mosaic_0001>
module attributes {stable_mosaic.version = 11 : i64} {
  func.func @_encoder_kernel(%arg0: i32, %arg1: i32, %arg2: memref<1x8x128xf32, #tpu.memory_space<vmem>>, %arg3: memref<1x8x128xf32, #tpu.memory_space<vmem>>, %arg4: memref<32x16xf32, #tpu.memory_space<vmem>>, %arg5: memref<1x32x128xf32, #tpu.memory_space<vmem>>) attributes {dimension_semantics = [#tpu.dimension_semantics<parallel>, #tpu.dimension_semantics<parallel>], iteration_bounds = array<i64: 2, 1>, scalar_prefetch = 0 : i64, scratch_operands = 0 : i64, tpu.core_type = #tpu.core_type<tc>, window_params = [{transform_indices = @transform_0, window_bounds = array<i64: 1, 8, 128>}, {transform_indices = @transform_1, window_bounds = array<i64: 1, 8, 128>}, {pipeline_mode = #tpu.pipeline_mode<synchronous>, transform_indices = @transform_2, window_bounds = array<i64: 32, 16>}, {transform_indices = @transform_3, window_bounds = array<i64: 1, 32, 128>}]} {
    %c0 = arith.constant 0 : index
    %c0_0 = arith.constant 0 : index
    %c0_1 = arith.constant 0 : index
    %0 = vector.load %arg2[%c0, %c0_0, %c0_1] : memref<1x8x128xf32, #tpu.memory_space<vmem>>, vector<1x8x128xf32>
    %1 = vector.shape_cast %0 : vector<1x8x128xf32> to vector<8x128xf32>
    %c0_2 = arith.constant 0 : index
    %c0_3 = arith.constant 0 : index
    %c0_4 = arith.constant 0 : index
    %2 = vector.load %arg3[%c0_2, %c0_3, %c0_4] : memref<1x8x128xf32, #tpu.memory_space<vmem>>, vector<1x8x128xf32>
    %3 = vector.shape_cast %2 : vector<1x8x128xf32> to vector<8x128xf32>
    %4 = tpu.concatenate %1, %3 in 0 : vector<8x128xf32>, vector<8x128xf32> -> vector<16x128xf32>
    %c0_5 = arith.constant 0 : index
    %c0_6 = arith.constant 0 : index
    %5 = vector.load %arg4[%c0_5, %c0_6] : memref<32x16xf32, #tpu.memory_space<vmem>>, vector<32x16xf32>
    %cst = arith.constant dense<0.000000e+00> : vector<32x128xf32>
    %6 = tpu.matmul %5, %4, %cst {dimension_numbers = #tpu.dot_dimension_numbers<[1], [0], [0], [1], [0, 0, 1, 1], [], []>} : vector<32x16xf32>, vector<16x128xf32>, vector<32x128xf32> -> vector<32x128xf32>
    %cst_7 = arith.constant 0.000000e+00 : f32
    %7 = vector.broadcast %cst_7 : f32 to vector<32x128xf32>
    %8 = arith.maximumf %6, %7 : vector<32x128xf32>
    %c0_8 = arith.constant 0 : index
    %c0_9 = arith.constant 0 : index
    %c0_10 = arith.constant 0 : index
    %9 = vector.load %arg5[%c0_8, %c0_9, %c0_10] : memref<1x32x128xf32, #tpu.memory_space<vmem>>, vector<1x32x128xf32>
    %10 = vector.shape_cast %9 : vector<1x32x128xf32> to vector<32x128xf32>
    %11 = vector.shape_cast %8 : vector<32x128xf32> to vector<1x32x128xf32>
    tpu.vector_store %arg5[%c0_8, %c0_9, %c0_10], %11 {strides = array<i32>} : memref<1x32x128xf32, #tpu.memory_space<vmem>>, vector<1x32x128xf32>,
    return
  }
  func.func @transform_0(%arg0: i32, %arg1: i32) -> (i32, i32, i32) {
    %c0_i32 = arith.constant 0 : i32
    %c0_i32_0 = arith.constant 0 : i32
    return %arg0, %c0_i32, %arg1 : i32, i32, i32
  }
  func.func @transform_1(%arg0: i32, %arg1: i32) -> (i32, i32, i32) {
    %c0_i32 = arith.constant 0 : i32
    %c0_i32_0 = arith.constant 0 : i32
    return %arg0, %c0_i32, %arg1 : i32, i32, i32
  }
  func.func @transform_2(%arg0: i32, %arg1: i32) -> (i32, i32) {
    %c0_i32 = arith.constant 0 : i32
    %c0_i32_0 = arith.constant 0 : i32
    %c0_i32_1 = arith.constant 0 : i32
    return %c0_i32, %c0_i32_0 : i32, i32
  }
  func.func @transform_3(%arg0: i32, %arg1: i32) -> (i32, i32, i32) {
    %c0_i32 = arith.constant 0 : i32
    %c0_i32_0 = arith.constant 0 : i32
    return %arg0, %c0_i32, %arg1 : i32, i32, i32
  }
}

</mosaic_0001>

<bundles_post_ra>
// kernel: tpu_custom_call.1
= control target key start
LH: loop header
LB: loop body
LE: loop exit
PB: predicated region body
PF: predicated region fallthrough
CT: control target
= control target key end

     0   :  { %s538_s12 = smov 0   ;;  %s540_s13 = smov 0   ;;  %s590_s0 = inlined_call_operand.vmem [shape: f32[2,8,7], index: 0, kind: input, shape index: {}]   ;;  %s591_s1 = inlined_call_operand.vmem [shape: f32[2,8,7], index: 1, kind: input, shape index: {}]   ;;  %s592_s2 = inlined_call_operand.vmem [shape: f32[32,16], index: 2, kind: input, shape index: {}]   ;;  %s593_s3 = inlined_call_operand.vmem [shape: f32[2,32,7], index: 3, kind: output, shape index: {}]  }
   0x1   :  { %s542_s14 = smov 0  }
   0x2 LB: > { %s25_s15 = sadd.s32 1, %s512_s13  ;;  %p438_p0 = scmp.ge.s32.totalorder %s516_s14, 1  ;;  %s516_s14 = sphi %s542_s14, %s13_s14   ;;  %s512_s13 = sphi %s540_s13, %s595_s13   ;;  %s508_s12 = sphi %s538_s12, %s594_s12  }
   0x3   : > { %p27_p1 = scmp.ge.s32.totalorder %s25_s15, 2  ;;  %p169_p2 = scmp.lt.s32.totalorder %s516_s14, 3 }
   0x5   : > { %s597_s15 = smov (%p27_p1, %s25_s15), 0  ;;  %p170_p3 = pnand %p438_p0, %p169_p2 }
   0x6   : > { %p205_p4 = scmp.lt.s32.totalorder (!%p170_p3), %s508_s12, 1 }
   0x7   : > { %173 = sbr.rel (%p170_p3) target bundleno = 218 (0xda), region = 32 }
   0xc   : > { %v229_v0 = vld [vmem:[%s592_s2] sm:$0xff]  ;;  %vm233_vm0 = vcmask 130048   ;;  %v231_v1 = vld [vmem:[%s592_s2 + $0x10] sm:$0xff]  ;;  %s599_s12 = smov (!%p205_p4, %s508_s12), 1  ;;  %v230_v4 = vld [vmem:[%s592_s2 + $0x8] sm:$0xff] }
   0xd   : > { %460 = vmatprep.mubr.msk.f32.mxu0 %vm233_vm0, %v229_v0  ;;  %463 = vmatprep.mubr.msk.f32.mxu1 %vm233_vm0, %v231_v1  ;;  %s439_s20 = sshll.u32 %s599_s12, 3  ;;  %v232_v5 = vld [vmem:[%s592_s2 + $0x18] sm:$0xff]  ;;  %s449_s4 = sshll.u32 %s599_s12, 5 }
   0xe   : > { %s218_s23 = scalar_lea.vmem %s591_s1, %s439_s20  ;;  %s211_s26 = scalar_lea.vmem %s590_s0, %s439_s20 }
   0xf   : > { %v228_v2 = vld [vmem:[%s218_s23] sm:$0xff]  ;;  %s226_s7 = scalar_lea.vmem %s593_s3, %s449_s4 }
  0x10   : > { %v227_v3 = vld [vmem:[%s211_s26] sm:$0xff]  ;;  %456 = vmatprep.subr.mxu0 %v228_v2  ;;  %466 = vmatprep.subr.mxu1 %v228_v2 }
  0x11   : > { %457 = vmatpush3.msra.mxu0 %v228_v2  ;;  %468 = vmatpush3.msra.mxu1 %v228_v2 }
  0x12   : > { %458 = vmatprep.subr.mxu0 %v227_v3  ;;  %467 = vmatprep.subr.mxu1 %v227_v3 }
  0x13   : > { %459 = vmatpush3.msra.mxu0 %v227_v3  ;;  %469 = vmatpush3.msra.mxu1 %v227_v3 }
  0x14   : > { %461 = vmatmul.mubr.msk.f32.vlgmr.msra.gmra.mxu0 %vm233_vm0, %v230_v4  ;;  %464 = vmatmul.mubr.msk.f32.vlgmr.msra.gmra.mxu1 %vm233_vm0, %v232_v5 }
  0xd4   : > { %v462_v6 = vpop.f32.mrf.mxu0  ;;  %v465_v7 = vpop.f32.mrf.mxu1 }
  0xd5   : > { %v332_v8 = vmax.f32 %v462_v6, 0.0  ;;  %v334_v9 = vmax.f32 %v465_v7, 0.0 }
  0xd6   : > { %v312_v10 = vpop.f32.mrf.mxu0  ;;  %v322_v11 = vpop.f32.mrf.mxu1 }
  0xd7   : > { %336 = vst [vmem:[%s226_s7 + $0x8] sm:$0xff] %v332_v8  ;;  %338 = vst [vmem:[%s226_s7 + $0x18] sm:$0xff] %v334_v9  ;;  %v331_v12 = vmax.f32 %v312_v10, 0.0  ;;  %v333_v13 = vmax.f32 %v322_v11, 0.0 }
  0xd9   : > { %335 = vst [vmem:[%s226_s7] sm:$0xff] %v331_v12  ;;  %337 = vst [vmem:[%s226_s7 + $0x10] sm:$0xff] %v333_v13 }
  0xda PF: > { %s13_s14 = sadd.s32 1, %s516_s14   ;;  %s594_s12 = smov %s512_s13 }
  0xdb   : > { %p10_p5 = scmp.ge.s32.totalorder %s13_s14, 4   ;;  %s595_s13 = smov %s597_s15 }
  0xdd   :  { %12 = sbr.rel (!%p10_p5) target bundleno = 2 (0x2), region = 65 }

</bundles_post_ra>
